<compile_context>
chip_gen: v7x
topology: tpu7x:2x2x1
jax: 0.10.0
libtpu: 0.0.40
codegen_flags: <defaults>
</compile_context>

<pallas_src>
import numpy as np
import jax
import jax.numpy as jnp
from jax import lax
from jax.experimental import pallas as pl
from jax.experimental.pallas import tpu as pltpu

# Scaled-down stand-ins for cfg values (real model: dim_conv5=2048, DIM_REDUCED=256)
DIM_CONV5 = 256      # dim_conv5 in the module
DIM_REDUCED = 128    # cfg.MRCNN.DIM_REDUCED (self.dim_out)

TILE_M = 256         # MXU-full M tile on v6e/v7x (use 128 on v5e)


# ----------------------------- Pallas kernel -------------------------------

def _upconv_gemm_relu_kernel(x_ref, w_ref, b_ref, o_ref):
    # x_ref: (TILE_M, K) bf16  -- one M tile of the fused (N_keep*H*W, C_in) LHS
    # w_ref: (K, F)      bf16  -- resident across the grid (constant index_map)
    # b_ref: (1, F)      f32   -- resident
    # o_ref: (TILE_M, F) bf16  -- lane-dense output tile (F = 4*C_out)
    acc = jnp.dot(x_ref[...], w_ref[...], preferred_element_type=jnp.float32)
    o_ref[...] = jnp.maximum(acc + b_ref[...], 0.0).astype(o_ref.dtype)


def _upconv_gemm_relu(x_mk, w2d, b2d):
    """relu(x_mk @ w2d + b2d) as one M-tiled GEMM.  x_mk: (M_pad, K) bf16."""
    M_pad, K = x_mk.shape
    F = w2d.shape[1]
    grid_m = M_pad // TILE_M
    flops = 2 * M_pad * K * F
    bytes_accessed = (M_pad * K * 2) + (K * F * 2) + (F * 4) + (M_pad * F * 2)
    return pl.pallas_call(
        _upconv_gemm_relu_kernel,
        out_shape=jax.ShapeDtypeStruct((M_pad, F), jnp.bfloat16),
        grid=(grid_m,),
        in_specs=[
            pl.BlockSpec((TILE_M, K), lambda m: (m, 0)),   # one M tile per step
            pl.BlockSpec((K, F), lambda m: (0, 0)),        # weight, resident
            pl.BlockSpec((1, F), lambda m: (0, 0)),        # bias, resident
        ],
        out_specs=pl.BlockSpec((TILE_M, F), lambda m: (m, 0)),
        compiler_params=pltpu.CompilerParams(
            dimension_semantics=("parallel",),
            vmem_limit_bytes=32 * 1024 * 1024),
        cost_estimate=pl.CostEstimate(
            flops=flops, transcendentals=0, bytes_accessed=bytes_accessed),
    )(x_mk, w2d, b2d)


# ------------------------------ Module glue --------------------------------

def init_params(key, dim_conv5=DIM_CONV5, dim_out=DIM_REDUCED):
    """Mimics _init_weights: GaussianFill(std=0.001) weight, constant-0 bias.
    ConvTranspose2d weight layout: (C_in, C_out, kH, kW)."""
    w = 0.001 * jax.random.normal(key, (dim_conv5, dim_out, 2, 2), jnp.float32)
    b = jnp.zeros((dim_out,), jnp.float32)
    return w, b


def mask_rcnn_fcn_head_v0upshare_forward(x_nchw, roi_has_mask_int32, w, b,
                                         training=True):
    """Forward pass of the head (training branch).

    x_nchw:             (N_roi, dim_conv5, H, W) res5 features (NCHW)
    roi_has_mask_int32: (N_roi,) host-side int array (as in the PyTorch code)
    returns:            (N_keep, dim_out, 2H, 2W) NCHW, ReLU'd upconv output (bf16)
    """
    if not training:
        # TODO(synk): inference branch needs the external roi_xform func and the
        # shared res5 module (not defined in this file); not translatable here.
        raise NotImplementedError

    N_all, C, H, W = x_nchw.shape
    C_out = w.shape[1]
    F = 4 * C_out

    # Same host-side index selection as the PyTorch code (np.nonzero).
    # TODO(synk): host-side nonzero breaks under jit of the wrapper; bucket
    # N_keep more coarsely if recompiles from varying ROI counts matter.
    inds = np.nonzero(np.asarray(roi_has_mask_int32) > 0)[0]
    if inds.size == 0:
        return jnp.zeros((0, C_out, 2 * H, 2 * W), jnp.bfloat16)
    x_sel = x_nchw[jnp.asarray(inds)]
    N = int(inds.size)
    M = N * H * W

    # One mem-bound layout pass: NCHW -> channels-last (M, K), fused with the
    # f32->bf16 cast and the pad to a TILE_M multiple (single XLA copy fusion).
    M_pad = ((M + TILE_M - 1) // TILE_M) * TILE_M
    x_mk = jnp.transpose(x_sel, (0, 2, 3, 1)).reshape(M, C).astype(jnp.bfloat16)
    x_mk = jnp.pad(x_mk, ((0, M_pad - M), (0, 0)))

    # Free reshape: (C_in, C_out, 2, 2) -> (C_in, 4*C_out), columns (co, kh, kw).
    w2d = w.reshape(C, F).astype(jnp.bfloat16)
    b2d = jnp.repeat(b.astype(jnp.float32), 4).reshape(1, F)

    y = _upconv_gemm_relu(x_mk, w2d, b2d)          # (M_pad, 4*C_out) bf16
    y = y[:M]

    # Scatter the 2x2 kernel positions onto the stride-2 upsampled grid -> NCHW.
    # TODO(synk): a channels-last downstream consumer could take y directly and
    # skip this layout pass entirely.
    y = y.reshape(N, H, W, C_out, 2, 2)
    y = jnp.transpose(y, (0, 3, 1, 4, 2, 5)).reshape(N, C_out, 2 * H, 2 * W)
    return y


# ------------------------------ Reference ----------------------------------

def _reference_forward(x_nchw, roi_has_mask_int32, w, b):
    """Pure-jnp f32 reference of the same math (select -> deconv2x2s2 -> relu)."""
    inds = np.nonzero(np.asarray(roi_has_mask_int32) > 0)[0]
    x = x_nchw[jnp.asarray(inds)]
    N, C, H, W = x.shape
    C_out = w.shape[1]
    # y[n, co, 2h+i, 2w+j] = relu(sum_c x[n,c,h,w] * w[c,co,i,j] + b[co])
    y = jnp.einsum('nchw,coij->nhwoij', x, w, precision=lax.Precision.HIGHEST)
    y = y + b[None, None, None, :, None, None]
    y = jnp.maximum(y, 0.0)
    y = jnp.transpose(y, (0, 3, 1, 4, 2, 5)).reshape(N, C_out, 2 * H, 2 * W)
    return y


# --------------------------------- Main -------------------------------------

if __name__ == "__main__":
    key = jax.random.PRNGKey(0)
    k_w, k_x = jax.random.split(key)

    N_roi, H, W = 4, 7, 7
    w, b = init_params(k_w)
    x = jax.random.normal(k_x, (N_roi, DIM_CONV5, H, W), jnp.float32)
    roi_has_mask = np.array([1, 0, 1, 1], dtype=np.int32)

    out = mask_rcnn_fcn_head_v0upshare_forward(x, roi_has_mask, w, b,
                                               training=True)
    out = jax.block_until_ready(out)

    ref = _reference_forward(x, roi_has_mask, w, b)
    assert out.shape == (3, DIM_REDUCED, 2 * H, 2 * W), out.shape
    # bf16 inputs/output with f32 accumulation -> loosened tolerance vs f32 ref.
    np.testing.assert_allclose(np.asarray(out, dtype=np.float32),
                               np.asarray(ref), rtol=5e-2, atol=1e-3)
    print("KERNEL_OK")
</pallas_src>

<mosaic_0001>
module attributes {stable_mosaic.version = 11 : i64} {
  func.func @_upconv_gemm_relu_kernel(%arg0: i32, %arg1: memref<256x256xbf16, #tpu.memory_space<vmem>>, %arg2: memref<256x512xbf16, #tpu.memory_space<vmem>>, %arg3: memref<1x512xf32, #tpu.memory_space<vmem>>, %arg4: memref<256x512xbf16, #tpu.memory_space<vmem>>) attributes {dimension_semantics = [#tpu.dimension_semantics<parallel>], iteration_bounds = array<i64: 1>, scalar_prefetch = 0 : i64, scratch_operands = 0 : i64, tpu.core_type = #tpu.core_type<tc>, window_params = [{transform_indices = @transform_0, window_bounds = array<i64: 256, 256>}, {pipeline_mode = #tpu.pipeline_mode<synchronous>, transform_indices = @transform_1, window_bounds = array<i64: 256, 512>}, {pipeline_mode = #tpu.pipeline_mode<synchronous>, transform_indices = @transform_2, window_bounds = array<i64: 1, 512>}, {transform_indices = @transform_3, window_bounds = array<i64: 256, 512>}]} {
    %c0 = arith.constant 0 : index
    %c0_0 = arith.constant 0 : index
    %0 = vector.load %arg1[%c0, %c0_0] : memref<256x256xbf16, #tpu.memory_space<vmem>>, vector<256x256xbf16>
    %c0_1 = arith.constant 0 : index
    %c0_2 = arith.constant 0 : index
    %1 = vector.load %arg2[%c0_1, %c0_2] : memref<256x512xbf16, #tpu.memory_space<vmem>>, vector<256x512xbf16>
    %cst = arith.constant dense<0.000000e+00> : vector<256x512xf32>
    %2 = tpu.matmul %0, %1, %cst {dimension_numbers = #tpu.dot_dimension_numbers<[1], [0], [0], [1], [0, 0, 1, 1], [], []>} : vector<256x256xbf16>, vector<256x512xbf16>, vector<256x512xf32> -> vector<256x512xf32>
    %c0_3 = arith.constant 0 : index
    %c0_4 = arith.constant 0 : index
    %3 = vector.load %arg3[%c0_3, %c0_4] : memref<1x512xf32, #tpu.memory_space<vmem>>, vector<1x512xf32>
    %4 = vector.broadcast %3 : vector<1x512xf32> to vector<256x512xf32>
    %5 = arith.addf %2, %4 : vector<256x512xf32>
    %cst_5 = arith.constant 0.000000e+00 : f32
    %6 = vector.broadcast %cst_5 : f32 to vector<256x512xf32>
    %7 = arith.maximumf %5, %6 : vector<256x512xf32>
    %8 = arith.truncf %7 : vector<256x512xf32> to vector<256x512xbf16>
    %c0_6 = arith.constant 0 : index
    %c0_7 = arith.constant 0 : index
    %9 = vector.load %arg4[%c0_6, %c0_7] : memref<256x512xbf16, #tpu.memory_space<vmem>>, vector<256x512xbf16>
    tpu.vector_store %arg4[%c0_6, %c0_7], %8 {strides = array<i32>} : memref<256x512xbf16, #tpu.memory_space<vmem>>, vector<256x512xbf16>,
    return
  }
  func.func @transform_0(%arg0: i32) -> (i32, i32) {
    %c0_i32 = arith.constant 0 : i32
    %c0_i32_0 = arith.constant 0 : i32
    return %arg0, %c0_i32 : i32, i32
  }
  func.func @transform_1(%arg0: i32) -> (i32, i32) {
    %c0_i32 = arith.constant 0 : i32
    %c0_i32_0 = arith.constant 0 : i32
    %c0_i32_1 = arith.constant 0 : i32
    return %c0_i32, %c0_i32_0 : i32, i32
  }
  func.func @transform_2(%arg0: i32) -> (i32, i32) {
    %c0_i32 = arith.constant 0 : i32
    %c0_i32_0 = arith.constant 0 : i32
    %c0_i32_1 = arith.constant 0 : i32
    return %c0_i32, %c0_i32_0 : i32, i32
  }
  func.func @transform_3(%arg0: i32) -> (i32, i32) {
    %c0_i32 = arith.constant 0 : i32
    %c0_i32_0 = arith.constant 0 : i32
    return %arg0, %c0_i32 : i32, i32
  }
}

</mosaic_0001>

<bundles_post_ra>
// kernel: tpu_custom_call.1
= control target key start
LH: loop header
LB: loop body
LE: loop exit
PB: predicated region body
PF: predicated region fallthrough
CT: control target
= control target key end

     0   :  { %8 = vsyncpa [#allocation3], 0  ;;  %s2276_s0 = inlined_call_operand.hbm [shape: bf16[256,256], index: 0, kind: input, shape index: {}]   ;;  %s2277_s1 = inlined_call_operand.hbm [shape: bf16[256,512], index: 1, kind: input, shape index: {}]   ;;  %s2278_s2 = inlined_call_operand.vmem [shape: f32[1,512], index: 2, kind: input, shape index: {}]   ;;  %s2279_s3 = inlined_call_operand.hbm [shape: bf16[256,512], index: 3, kind: output, shape index: {}]  }
   0x1   :  { %9 = vsyncpa [#allocation6], 0 }
   0x2   :  { %10 = vsyncpa [#allocation4], 0  ;;  %s2068_s12 = smov [#allocation2]   ;;  %s1996_s16 = scalar_lea.hbm %s2276_s0, 4096 }
   0x3   :  { %s16_s13 = sshll.u32 %s2068_s12, 4  ;;  %p1997_p0 = scmp.ne.s32.totalorder %s2276_s0, %s1996_s16  ;;  %s17_s13 = int_to_ptr.vmem [resolvable:$true] %s16_s13 }
   0x4   :  { %p2000_p1 = scmp.lt.u32.totalorder %s1996_s16, %s2276_s0 }
   0x6   :  { %p2002_p2 = pnand %p2000_p1, %p1997_p0 }
   0x8   :  { %2005 = shalt.err (!%p2002_p2)
}
   0x9   :  { %s2006_s21 = scalar_lea.vmem %s17_s13, 4096  ;;  %p2011_p4 = scmp.lt.s32.totalorder %s17_s13, %s17_s13 }
   0xa   :  { %p2007_p3 = scmp.ne.s32.totalorder %s17_s13, %s2006_s21  ;;  %p2012_p5 = scmp.lt.s32.totalorder %s2006_s21, %s2006_s21 }
   0xc   :  { %p2013_p6 = por %p2012_p5, %p2011_p4 }
   0xe   :  { %p2014_p7 = pnand %p2013_p6, %p2007_p3 }
  0x10   :  { %2017 = shalt.err (!%p2014_p7)
}
  0x11   :  { %s2069_s22 = smov 128   ;;  %s2070_s23 = smov 8  }
  0x12   :  { %22 = dma.hbm_to_vmem [thread:$0]  %s2276_s0, 4096, %s17_s13, [#allocation3], %s2069_s22, %s2069_s22, %s2070_s23  }
  0x13   :  { %s2071_s26 = smov [#allocation5]   ;;  %s2018_s30 = scalar_lea.hbm %s2277_s1, 8192 }
  0x14   :  { %s28_s27 = sshll.u32 %s2071_s26, 4  ;;  %p2019_p8 = scmp.ne.s32.totalorder %s2277_s1, %s2018_s30  ;;  %s29_s27 = int_to_ptr.vmem [resolvable:$true] %s28_s27 }
  0x15   :  { %p2022_p9 = scmp.lt.u32.totalorder %s2018_s30, %s2277_s1 }
  0x17   :  { %p2024_p10 = pnand %p2022_p9, %p2019_p8 }
  0x19   :  { %2027 = shalt.err (!%p2024_p10)
}
  0x1a   :  { %s2028_s8 = scalar_lea.vmem %s29_s27, 8192  ;;  %p2033_p12 = scmp.lt.s32.totalorder %s29_s27, %s29_s27 }
  0x1b   :  { %p2029_p11 = scmp.ne.s32.totalorder %s29_s27, %s2028_s8  ;;  %p2034_p13 = scmp.lt.s32.totalorder %s2028_s8, %s2028_s8 }
  0x1d   :  { %p2035_p0 = por %p2034_p13, %p2033_p12 }
  0x1f   :  { %p2036_p1 = pnand %p2035_p0, %p2029_p11 }
  0x21   :  { %2039 = shalt.err (!%p2036_p1)
}
  0x22   :  { %s2072_s0 = smov 256   ;;  %s2073_s9 = smov 16  }
  0x23   :  { %34 = dma.hbm_to_vmem [thread:$0]  %s2277_s1, 8192, %s29_s27, [#allocation6], %s2072_s0, %s2072_s0, %s2073_s9  }
  0x24   :  { %2062 = dma.done.wait [#allocation3], 4096  }
  0x25   :  { %2063 = vsyncadd [#allocation3], 4294963200 }
  0x26   :  { %2064 = dma.done.wait [#allocation6], 8192  }
  0x27   :  { %2065 = vsyncadd [#allocation6], 4294959104  ;;  %v1852_v0 = vld [vmem:[#allocation5 + $0x4] ss:$16 sps:$4 sm:$0xff]   ;;  %v1854_v1 = vld [vmem:[#allocation5 + $0xc] ss:$16 sps:$4 sm:$0xff]  }
  0x28   :  { %641 = vmatprep.subr.bf16.mxu0 %v1852_v0  ;;  %v1856_v2 = vld [vmem:[#allocation5] ss:$16 sps:$4 sm:$0xff]   ;;  %v1857_v3 = vld [vmem:[#allocation5 + $0x8] ss:$16 sps:$4 sm:$0xff]   ;;  %834 = vmatprep.subr.bf16.mxu1 %v1854_v1  ;;  %v1858_v4 = vld [vmem:[#allocation5 + $0x24] ss:$16 sps:$4 sm:$0xff]  }
  0x29   :  { %642 = vmatpush1.bf16.msra.mxu0 %v1856_v2  ;;  %835 = vmatpush1.bf16.msra.mxu1 %v1857_v3  ;;  %v1860_v5 = vld [vmem:[#allocation5 + $0x2c] ss:$16 sps:$4 sm:$0xff]   ;;  %v1862_v6 = vld [vmem:[#allocation5 + $0x20] ss:$16 sps:$4 sm:$0xff]   ;;  %v1863_v7 = vld [vmem:[#allocation5 + $0x28] ss:$16 sps:$4 sm:$0xff]  }
  0x2a   :  { %643 = vmatprep.subr.bf16.mxu0 %v1858_v4  ;;  %836 = vmatprep.subr.bf16.mxu1 %v1860_v5  ;;  %v1864_v8 = vld [vmem:[#allocation5 + $0x44] ss:$16 sps:$4 sm:$0xff]   ;;  %v1866_v9 = vld [vmem:[#allocation5 + $0x4c] ss:$16 sps:$4 sm:$0xff]   ;;  %v1868_v10 = vld [vmem:[#allocation5 + $0x40] ss:$16 sps:$4 sm:$0xff]  }
  0x2b   :  { %v1869_v11 = vld [vmem:[#allocation5 + $0x48] ss:$16 sps:$4 sm:$0xff]   ;;  %v1870_v12 = vld [vmem:[#allocation5 + $0x64] ss:$16 sps:$4 sm:$0xff]   ;;  %v1872_v13 = vld [vmem:[#allocation5 + $0x6c] ss:$16 sps:$4 sm:$0xff]  }
  0x2c   :  { %v1874_v14 = vld [vmem:[#allocation5 + $0x60] ss:$16 sps:$4 sm:$0xff]   ;;  %v1875_v15 = vld [vmem:[#allocation5 + $0x68] ss:$16 sps:$4 sm:$0xff]   ;;  %v1876_v16 = vld [vmem:[#allocation5 + $0x84] ss:$16 sps:$4 sm:$0xff]  }
  0x2d   :  { %644 = vmatpush1.bf16.msra.mxu0 %v1862_v6  ;;  %837 = vmatpush1.bf16.msra.mxu1 %v1863_v7  ;;  %v1878_v17 = vld [vmem:[#allocation5 + $0x8c] ss:$16 sps:$4 sm:$0xff]   ;;  %v1880_v18 = vld [vmem:[#allocation5 + $0x80] ss:$16 sps:$4 sm:$0xff]   ;;  %v1881_v19 = vld [vmem:[#allocation5 + $0x88] ss:$16 sps:$4 sm:$0xff]  }
  0x2e   :  { %645 = vmatprep.subr.bf16.mxu0 %v1864_v8  ;;  %838 = vmatprep.subr.bf16.mxu1 %v1866_v9  ;;  %v1882_v20 = vld [vmem:[#allocation5 + $0xa4] ss:$16 sps:$4 sm:$0xff]   ;;  %v1884_v21 = vld [vmem:[#allocation5 + $0xac] ss:$16 sps:$4 sm:$0xff]   ;;  %v1886_v22 = vld [vmem:[#allocation5 + $0xa0] ss:$16 sps:$4 sm:$0xff]  }
  0x2f   :  { %v1887_v23 = vld [vmem:[#allocation5 + $0xa8] ss:$16 sps:$4 sm:$0xff]   ;;  %v1888_v24 = vld [vmem:[#allocation5 + $0xc4] ss:$16 sps:$4 sm:$0xff]   ;;  %v1890_v25 = vld [vmem:[#allocation5 + $0xcc] ss:$16 sps:$4 sm:$0xff]  }
  0x30   :  { %v1892_v26 = vld [vmem:[#allocation5 + $0xc0] ss:$16 sps:$4 sm:$0xff]   ;;  %v1893_v27 = vld [vmem:[#allocation5 + $0xc8] ss:$16 sps:$4 sm:$0xff]   ;;  %v1894_v28 = vld [vmem:[#allocation5 + $0xe4] ss:$16 sps:$4 sm:$0xff]  }
  0x31   :  { %646 = vmatpush1.bf16.msra.mxu0 %v1868_v10  ;;  %839 = vmatpush1.bf16.msra.mxu1 %v1869_v11  ;;  %v1896_v29 = vld [vmem:[#allocation5 + $0xec] ss:$16 sps:$4 sm:$0xff]   ;;  %v1898_v30 = vld [vmem:[#allocation5 + $0xe0] ss:$16 sps:$4 sm:$0xff]   ;;  %v1899_v31 = vld [vmem:[#allocation5 + $0xe8] ss:$16 sps:$4 sm:$0xff]  }
  0x32   :  { %647 = vmatprep.subr.bf16.mxu0 %v1870_v12  ;;  %840 = vmatprep.subr.bf16.mxu1 %v1872_v13  ;;  %v1900_v32 = vld [vmem:[#allocation5 + $0x104] ss:$16 sps:$4 sm:$0xff]   ;;  %v1902_v33 = vld [vmem:[#allocation5 + $0x10c] ss:$16 sps:$4 sm:$0xff]   ;;  %v1904_v34 = vld [vmem:[#allocation5 + $0x100] ss:$16 sps:$4 sm:$0xff]  }
  0x33   :  { %v1905_v35 = vld [vmem:[#allocation5 + $0x108] ss:$16 sps:$4 sm:$0xff]   ;;  %v1906_v36 = vld [vmem:[#allocation5 + $0x124] ss:$16 sps:$4 sm:$0xff]   ;;  %v1908_v37 = vld [vmem:[#allocation5 + $0x12c] ss:$16 sps:$4 sm:$0xff]  }
  0x34   :  { %v1910_v38 = vld [vmem:[#allocation5 + $0x120] ss:$16 sps:$4 sm:$0xff]   ;;  %v1911_v39 = vld [vmem:[#allocation5 + $0x128] ss:$16 sps:$4 sm:$0xff]   ;;  %v1912_v40 = vld [vmem:[#allocation5 + $0x144] ss:$16 sps:$4 sm:$0xff]  }
  0x35   :  { %648 = vmatpush1.bf16.msra.mxu0 %v1874_v14  ;;  %841 = vmatpush1.bf16.msra.mxu1 %v1875_v15  ;;  %v1914_v41 = vld [vmem:[#allocation5 + $0x14c] ss:$16 sps:$4 sm:$0xff]   ;;  %v1916_v42 = vld [vmem:[#allocation5 + $0x140] ss:$16 sps:$4 sm:$0xff]   ;;  %v1917_v43 = vld [vmem:[#allocation5 + $0x148] ss:$16 sps:$4 sm:$0xff]  }
  0x36   :  { %649 = vmatprep.subr.bf16.mxu0 %v1876_v16  ;;  %842 = vmatprep.subr.bf16.mxu1 %v1878_v17  ;;  %v1918_v44 = vld [vmem:[#allocation5 + $0x164] ss:$16 sps:$4 sm:$0xff]   ;;  %v1920_v45 = vld [vmem:[#allocation5 + $0x16c] ss:$16 sps:$4 sm:$0xff]   ;;  %v1922_v46 = vld [vmem:[#allocation5 + $0x160] ss:$16 sps:$4 sm:$0xff]  }
  0x37   :  { %v1923_v47 = vld [vmem:[#allocation5 + $0x168] ss:$16 sps:$4 sm:$0xff]   ;;  %v1950_v48 = vld [vmem:[#allocation2 + $0x4] ss:$8 sps:$4 sm:$0xff]   ;;  %v1928_v51 = vld [vmem:[#allocation5 + $0x180] ss:$16 sps:$4 sm:$0xff]  }
  0x38   :  { %v1924_v49 = vld [vmem:[#allocation5 + $0x184] ss:$16 sps:$4 sm:$0xff]   ;;  %v1926_v50 = vld [vmem:[#allocation5 + $0x18c] ss:$16 sps:$4 sm:$0xff]   ;;  %673 = vmatprep.mubr.bf16.mxu0 %v1950_v48  ;;  %866 = vmatprep.mubr.bf16.mxu1 %v1950_v48  ;;  %v1929_v52 = vld [vmem:[#allocation5 + $0x188] ss:$16 sps:$4 sm:$0xff]  }
  0x39   :  { %650 = vmatpush1.bf16.msra.mxu0 %v1880_v18  ;;  %843 = vmatpush1.bf16.msra.mxu1 %v1881_v19  ;;  %v1930_v53 = vld [vmem:[#allocation5 + $0x1a4] ss:$16 sps:$4 sm:$0xff]   ;;  %v1932_v54 = vld [vmem:[#allocation5 + $0x1ac] ss:$16 sps:$4 sm:$0xff]   ;;  %v1934_v55 = vld [vmem:[#allocation5 + $0x1a0] ss:$16 sps:$4 sm:$0xff]  }
  0x3a   :  { %651 = vmatprep.subr.bf16.mxu0 %v1882_v20  ;;  %844 = vmatprep.subr.bf16.mxu1 %v1884_v21  ;;  %v1935_v56 = vld [vmem:[#allocation5 + $0x1a8] ss:$16 sps:$4 sm:$0xff]   ;;  %v1936_v57 = vld [vmem:[#allocation5 + $0x1c4] ss:$16 sps:$4 sm:$0xff]   ;;  %v1938_v58 = vld [vmem:[#allocation5 + $0x1cc] ss:$16 sps:$4 sm:$0xff]  }
  0x3b   :  { %v1940_v59 = vld [vmem:[#allocation5 + $0x1c0] ss:$16 sps:$4 sm:$0xff]   ;;  %v1941_v60 = vld [vmem:[#allocation5 + $0x1c8] ss:$16 sps:$4 sm:$0xff]   ;;  %v1942_v61 = vld [vmem:[#allocation5 + $0x1e4] ss:$16 sps:$4 sm:$0xff]  }
  0x3c   :  { %v1944_v62 = vld [vmem:[#allocation5 + $0x1ec] ss:$16 sps:$4 sm:$0xff]   ;;  %v1946_v63 = vld [vmem:[#allocation5 + $0x1e0] ss:$16 sps:$4 sm:$0xff]   ;;  %v1947_v0 = vld [vmem:[#allocation5 + $0x1e8] ss:$16 sps:$4 sm:$0xff]  }
  0x3d   :  { %652 = vmatpush1.bf16.msra.mxu0 %v1886_v22  ;;  %845 = vmatpush1.bf16.msra.mxu1 %v1887_v23  ;;  %v1948_v1 = vld [vmem:[#allocation2] ss:$8 sps:$4 sm:$0xff]   ;;  %v1951_v2 = vld [vmem:[#allocation2 + $0x14] ss:$8 sps:$4 sm:$0xff]   ;;  %v1953_v3 = vld [vmem:[#allocation2 + $0x10] ss:$8 sps:$4 sm:$0xff]  }
  0x3e   :  { %653 = vmatprep.subr.bf16.mxu0 %v1888_v24  ;;  %846 = vmatprep.subr.bf16.mxu1 %v1890_v25  ;;  %v1954_v4 = vld [vmem:[#allocation2 + $0x24] ss:$8 sps:$4 sm:$0xff]   ;;  %v1956_v5 = vld [vmem:[#allocation2 + $0x20] ss:$8 sps:$4 sm:$0xff]   ;;  %v1957_v6 = vld [vmem:[#allocation2 + $0x34] ss:$8 sps:$4 sm:$0xff]  }
  0x3f   :  { %v1959_v7 = vld [vmem:[#allocation2 + $0x30] ss:$8 sps:$4 sm:$0xff]   ;;  %v1960_v8 = vld [vmem:[#allocation2 + $0x44] ss:$8 sps:$4 sm:$0xff]   ;;  %v1962_v9 = vld [vmem:[#allocation2 + $0x40] ss:$8 sps:$4 sm:$0xff]  }
  0x40   :  { %v1963_v10 = vld [vmem:[#allocation2 + $0x54] ss:$8 sps:$4 sm:$0xff]   ;;  %v1965_v11 = vld [vmem:[#allocation2 + $0x50] ss:$8 sps:$4 sm:$0xff]   ;;  %v1966_v12 = vld [vmem:[#allocation2 + $0x64] ss:$8 sps:$4 sm:$0xff]  }
  0x41   :  { %654 = vmatpush1.bf16.msra.mxu0 %v1892_v26  ;;  %847 = vmatpush1.bf16.msra.mxu1 %v1893_v27  ;;  %v1968_v13 = vld [vmem:[#allocation2 + $0x60] ss:$8 sps:$4 sm:$0xff]   ;;  %v1969_v14 = vld [vmem:[#allocation2 + $0x74] ss:$8 sps:$4 sm:$0xff]   ;;  %v1971_v15 = vld [vmem:[#allocation2 + $0x70] ss:$8 sps:$4 sm:$0xff]  }
  0x42   :  { %655 = vmatprep.subr.bf16.mxu0 %v1894_v28  ;;  %848 = vmatprep.subr.bf16.mxu1 %v1896_v29  ;;  %v1972_v16 = vld [vmem:[#allocation2 + $0x84] ss:$8 sps:$4 sm:$0xff]   ;;  %v1974_v17 = vld [vmem:[#allocation2 + $0x80] ss:$8 sps:$4 sm:$0xff]   ;;  %v1975_v18 = vld [vmem:[#allocation2 + $0x94] ss:$8 sps:$4 sm:$0xff]  }
  0x43   :  { %v1977_v19 = vld [vmem:[#allocation2 + $0x90] ss:$8 sps:$4 sm:$0xff]   ;;  %v1978_v20 = vld [vmem:[#allocation2 + $0xa4] ss:$8 sps:$4 sm:$0xff]   ;;  %v1980_v21 = vld [vmem:[#allocation2 + $0xa0] ss:$8 sps:$4 sm:$0xff]  }
  0x44   :  { %v1981_v22 = vld [vmem:[#allocation2 + $0xb4] ss:$8 sps:$4 sm:$0xff]   ;;  %v1983_v23 = vld [vmem:[#allocation2 + $0xb0] ss:$8 sps:$4 sm:$0xff]   ;;  %v1984_v24 = vld [vmem:[#allocation2 + $0xc4] ss:$8 sps:$4 sm:$0xff]  }
  0x45   :  { %656 = vmatpush1.bf16.msra.mxu0 %v1898_v30  ;;  %849 = vmatpush1.bf16.msra.mxu1 %v1899_v31  ;;  %v1986_v25 = vld [vmem:[#allocation2 + $0xc0] ss:$8 sps:$4 sm:$0xff]   ;;  %v1987_v26 = vld [vmem:[#allocation2 + $0xd4] ss:$8 sps:$4 sm:$0xff]   ;;  %v1989_v27 = vld [vmem:[#allocation2 + $0xd0] ss:$8 sps:$4 sm:$0xff]  }
  0x46   :  { %657 = vmatprep.subr.bf16.mxu0 %v1900_v32  ;;  %850 = vmatprep.subr.bf16.mxu1 %v1902_v33  ;;  %v1990_v28 = vld [vmem:[#allocation2 + $0xe4] ss:$8 sps:$4 sm:$0xff]   ;;  %v1992_v29 = vld [vmem:[#allocation2 + $0xe0] ss:$8 sps:$4 sm:$0xff]   ;;  %v1993_v30 = vld [vmem:[#allocation2 + $0xf4] ss:$8 sps:$4 sm:$0xff]   ;;  %v141_v32 = vlaneseq }
  0x47   :  { %v1995_v31 = vld [vmem:[#allocation2 + $0xf0] ss:$8 sps:$4 sm:$0xff]  }
  0x48   :  { %v142_v33 = vshrl.u32 %v141_v32, 7 }
  0x49   :  { %658 = vmatpush1.bf16.msra.mxu0 %v1904_v34  ;;  %851 = vmatpush1.bf16.msra.mxu1 %v1905_v35 }
  0x4a   :  { %659 = vmatprep.subr.bf16.mxu0 %v1906_v36  ;;  %852 = vmatprep.subr.bf16.mxu1 %v1908_v37  ;;  %v143_v34 = vsub.s32 0, %v142_v33  ;;  %v151_v35 = vsub.s32 2, %v142_v33  ;;  %v139_v36 = vld [vmem:[%s2278_s2] sm:$0xf]  ;;  %v147_v37 = vsub.s32 1, %v142_v33  ;;  %s2074_s2 = smov [#allocation7]  }
  0x4b   :  { %s1608_s13 = sshll.u32 %s2074_s2, 4  ;;  %s1609_s13 = int_to_ptr.vmem [resolvable:$true] %s1608_s13 }
  0x4c   :  { %s2040_s14 = scalar_lea.vmem %s1609_s13, 8192  ;;  %p2045_p3 = scmp.lt.s32.totalorder %s1609_s13, %s1609_s13 }
  0x4d   :  { %660 = vmatpush1.bf16.msra.mxu0 %v1910_v38  ;;  %853 = vmatpush1.bf16.msra.mxu1 %v1911_v39  ;;  %v155_v38 = vsub.s32 3, %v142_v33  ;;  %v2125_v39 = vrot.slane %v139_v36, %v143_v34  ;;  %p2041_p2 = scmp.ne.s32.totalorder %s1609_s13, %s2040_s14  ;;  %p2046_p4 = scmp.lt.s32.totalorder %s2040_s14, %s2040_s14 }
  0x4e   :  { %661 = vmatprep.subr.bf16.mxu0 %v1912_v40  ;;  %854 = vmatprep.subr.bf16.mxu1 %v1914_v41  ;;  %v2127_v40 = vrot.slane %v139_v36, %v151_v35  ;;  %v2129_v41 = vrot.slane %v139_v36, %v147_v37 }
  0x4f   :  { %p2047_p5 = por %p2046_p4, %p2045_p3 }
  0x51   :  { %662 = vmatpush1.bf16.msra.mxu0 %v1916_v42  ;;  %855 = vmatpush1.bf16.msra.mxu1 %v1917_v43  ;;  %v2131_v42 = vrot.slane %v139_v36, %v155_v38  ;;  %p2048_p6 = pnand %p2047_p5, %p2041_p2 }
  0x52   :  { %663 = vmatprep.subr.bf16.mxu0 %v1918_v44  ;;  %856 = vmatprep.subr.bf16.mxu1 %v1920_v45 }
  0x55   :  { %664 = vmatpush1.bf16.msra.mxu0 %v1922_v46  ;;  %857 = vmatpush1.bf16.msra.mxu1 %v1923_v47 }
  0x56   :  { %665 = vmatprep.subr.bf16.mxu0 %v1924_v49  ;;  %858 = vmatprep.subr.bf16.mxu1 %v1926_v50 }
  0x59   :  { %666 = vmatpush1.bf16.msra.mxu0 %v1928_v51  ;;  %859 = vmatpush1.bf16.msra.mxu1 %v1929_v52 }
  0x5a   :  { %667 = vmatprep.subr.bf16.mxu0 %v1930_v53  ;;  %860 = vmatprep.subr.bf16.mxu1 %v1932_v54 }
  0x5d   :  { %668 = vmatpush1.bf16.msra.mxu0 %v1934_v55  ;;  %861 = vmatpush1.bf16.msra.mxu1 %v1935_v56 }
  0x5e   :  { %669 = vmatprep.subr.bf16.mxu0 %v1936_v57  ;;  %862 = vmatprep.subr.bf16.mxu1 %v1938_v58 }
  0x61   :  { %670 = vmatpush1.bf16.msra.mxu0 %v1940_v59  ;;  %863 = vmatpush1.bf16.msra.mxu1 %v1941_v60 }
  0x62   :  { %671 = vmatprep.subr.bf16.mxu0 %v1942_v61  ;;  %864 = vmatprep.subr.bf16.mxu1 %v1944_v62 }
  0x65   :  { %672 = vmatpush1.bf16.msra.mxu0 %v1946_v63  ;;  %865 = vmatpush1.bf16.msra.mxu1 %v1947_v0 }
  0x68   :  { %674 = vmatmul.mubr.bf16.vlgmr.msra.gmra.mrb[0].mxu0 %v1948_v1  ;;  %867 = vmatmul.mubr.bf16.vlgmr.msra.gmra.mrb[0].mxu1 %v1948_v1 }
  0x69   :  { %683 = vmatprep.mubr.bf16.mxu0 %v1951_v2  ;;  %876 = vmatprep.mubr.bf16.mxu1 %v1951_v2 }
  0x70   :  { %684 = vmatmul.mubr.bf16.gmra.mrb[4].mxu0 %v1953_v3  ;;  %877 = vmatmul.mubr.bf16.gmra.mrb[4].mxu1 %v1953_v3 }
  0x71   :  { %693 = vmatprep.mubr.bf16.mxu0 %v1954_v4  ;;  %886 = vmatprep.mubr.bf16.mxu1 %v1954_v4 }
  0x78   :  { %694 = vmatmul.mubr.bf16.gmra.mrb[8].mxu0 %v1956_v5  ;;  %887 = vmatmul.mubr.bf16.gmra.mrb[8].mxu1 %v1956_v5 }
  0x79   :  { %703 = vmatprep.mubr.bf16.mxu0 %v1957_v6  ;;  %896 = vmatprep.mubr.bf16.mxu1 %v1957_v6 }
  0x80   :  { %704 = vmatmul.mubr.bf16.gmra.mrb[12].mxu0 %v1959_v7  ;;  %897 = vmatmul.mubr.bf16.gmra.mrb[12].mxu1 %v1959_v7 }
  0x81   :  { %713 = vmatprep.mubr.bf16.mxu0 %v1960_v8  ;;  %906 = vmatprep.mubr.bf16.mxu1 %v1960_v8 }
  0x88   :  { %714 = vmatmul.mubr.bf16.gmra.mrb[16].mxu0 %v1962_v9  ;;  %907 = vmatmul.mubr.bf16.gmra.mrb[16].mxu1 %v1962_v9 }
  0x89   :  { %723 = vmatprep.mubr.bf16.mxu0 %v1963_v10  ;;  %916 = vmatprep.mubr.bf16.mxu1 %v1963_v10 }
  0x90   :  { %724 = vmatmul.mubr.bf16.gmra.mrb[20].mxu0 %v1965_v11  ;;  %917 = vmatmul.mubr.bf16.gmra.mrb[20].mxu1 %v1965_v11 }
  0x91   :  { %733 = vmatprep.mubr.bf16.mxu0 %v1966_v12  ;;  %926 = vmatprep.mubr.bf16.mxu1 %v1966_v12 }
  0x98   :  { %734 = vmatmul.mubr.bf16.gmra.mrb[24].mxu0 %v1968_v13  ;;  %927 = vmatmul.mubr.bf16.gmra.mrb[24].mxu1 %v1968_v13 }
  0x99   :  { %743 = vmatprep.mubr.bf16.mxu0 %v1969_v14  ;;  %936 = vmatprep.mubr.bf16.mxu1 %v1969_v14 }
  0xa0   :  { %744 = vmatmul.mubr.bf16.gmra.mrb[28].mxu0 %v1971_v15  ;;  %937 = vmatmul.mubr.bf16.gmra.mrb[28].mxu1 %v1971_v15 }
  0xa1   :  { %753 = vmatprep.mubr.bf16.mxu0 %v1972_v16  ;;  %946 = vmatprep.mubr.bf16.mxu1 %v1972_v16 }
  0xa8   :  { %754 = vmatmul.mubr.bf16.gmra.mrb[32].mxu0 %v1974_v17  ;;  %947 = vmatmul.mubr.bf16.gmra.mrb[32].mxu1 %v1974_v17 }
  0xa9   :  { %763 = vmatprep.mubr.bf16.mxu0 %v1975_v18  ;;  %956 = vmatprep.mubr.bf16.mxu1 %v1975_v18 }
  0xb0   :  { %764 = vmatmul.mubr.bf16.gmra.mrb[36].mxu0 %v1977_v19  ;;  %957 = vmatmul.mubr.bf16.gmra.mrb[36].mxu1 %v1977_v19 }
  0xb1   :  { %773 = vmatprep.mubr.bf16.mxu0 %v1978_v20  ;;  %966 = vmatprep.mubr.bf16.mxu1 %v1978_v20 }
  0xb8   :  { %774 = vmatmul.mubr.bf16.gmra.mrb[40].mxu0 %v1980_v21  ;;  %967 = vmatmul.mubr.bf16.gmra.mrb[40].mxu1 %v1980_v21 }
  0xb9   :  { %783 = vmatprep.mubr.bf16.mxu0 %v1981_v22  ;;  %976 = vmatprep.mubr.bf16.mxu1 %v1981_v22 }
  0xc0   :  { %784 = vmatmul.mubr.bf16.gmra.mrb[44].mxu0 %v1983_v23  ;;  %977 = vmatmul.mubr.bf16.gmra.mrb[44].mxu1 %v1983_v23 }
  0xc1   :  { %793 = vmatprep.mubr.bf16.mxu0 %v1984_v24  ;;  %986 = vmatprep.mubr.bf16.mxu1 %v1984_v24 }
  0xc8   :  { %794 = vmatmul.mubr.bf16.gmra.mrb[48].mxu0 %v1986_v25  ;;  %987 = vmatmul.mubr.bf16.gmra.mrb[48].mxu1 %v1986_v25 }
  0xc9   :  { %803 = vmatprep.mubr.bf16.mxu0 %v1987_v26  ;;  %996 = vmatprep.mubr.bf16.mxu1 %v1987_v26 }
  0xd0   :  { %804 = vmatmul.mubr.bf16.gmra.mrb[52].mxu0 %v1989_v27  ;;  %997 = vmatmul.mubr.bf16.gmra.mrb[52].mxu1 %v1989_v27 }
  0xd1   :  { %813 = vmatprep.mubr.bf16.mxu0 %v1990_v28  ;;  %1006 = vmatprep.mubr.bf16.mxu1 %v1990_v28 }
  0xd8   :  { %814 = vmatmul.mubr.bf16.gmra.mrb[56].mxu0 %v1992_v29  ;;  %1007 = vmatmul.mubr.bf16.gmra.mrb[56].mxu1 %v1992_v29 }
  0xd9   :  { %823 = vmatprep.mubr.bf16.mxu0 %v1993_v30  ;;  %1016 = vmatprep.mubr.bf16.mxu1 %v1993_v30 }
  0xe0   :  { %824 = vmatmul.mubr.bf16.gmra.mrb[60].mxu0 %v1995_v31  ;;  %1017 = vmatmul.mubr.bf16.gmra.mrb[60].mxu1 %v1995_v31 }
 0x13b   :  { %v675_v43 = vpop.f32.mrb[0].mxu0  ;;  %v868_v44 = vpop.f32.mrb[0].mxu1 }
 0x13c   :  { %v676_v45 = vadd.f32 %v675_v43, %v2125_v39  ;;  %v869_v46 = vadd.f32 %v868_v44, %v2127_v40  ;;  %v677_v47 = vpop.f32.mrb[1].mxu0  ;;  %v870_v48 = vpop.f32.mrb[1].mxu1 }
 0x13d   :  { %v678_v49 = vadd.f32 %v677_v47, %v2129_v41  ;;  %v871_v50 = vadd.f32 %v870_v48, %v2131_v42  ;;  %v679_v51 = vpop.f32.mrb[2].mxu0  ;;  %v872_v52 = vpop.f32.mrb[2].mxu1 }
 0x13e   :  { %v1027_v53 = vmax.f32 %v676_v45, 0.0  ;;  %v1029_v54 = vmax.f32 %v869_v46, 0.0  ;;  %v680_v55 = vadd.f32 %v679_v51, %v2125_v39  ;;  %v873_v56 = vadd.f32 %v872_v52, %v2127_v40  ;;  %v681_v57 = vpop.f32.mrb[3].mxu0  ;;  %v874_v58 = vpop.f32.mrb[3].mxu1 }
 0x13f   :  { %v1028_v59 = vmax.f32 %v678_v49, 0.0  ;;  %v1030_v60 = vmax.f32 %v871_v50, 0.0  ;;  %v682_v61 = vadd.f32 %v681_v57, %v2129_v41  ;;  %v875_v62 = vadd.f32 %v874_v58, %v2131_v42 }
 0x140   :  { %v1031_v63 = vmax.f32 %v680_v55, 0.0  ;;  %v1033_v0 = vmax.f32 %v873_v56, 0.0 }
 0x141   :  { %v1781_v1 = vpack.c.bf16 %v1028_v59, %v1027_v53  ;;  %v1782_v2 = vpack.c.bf16 %v1030_v60, %v1029_v54  ;;  %v1032_v3 = vmax.f32 %v682_v61, 0.0  ;;  %v1034_v4 = vmax.f32 %v875_v62, 0.0 }
 0x143   :  { %1539 = vst [vmem:[#allocation7] sm:$0xff] %v1781_v1  ;;  %1540 = vst [vmem:[#allocation7 + $0x8] sm:$0xff] %v1782_v2  ;;  %v1783_v5 = vpack.c.bf16 %v1032_v3, %v1031_v63  ;;  %v1784_v6 = vpack.c.bf16 %v1034_v4, %v1033_v0  ;;  %v685_v7 = vpop.f32.mrb[4].mxu0  ;;  %v878_v8 = vpop.f32.mrb[4].mxu1 }
 0x144   :  { %v686_v9 = vadd.f32 %v685_v7, %v2125_v39  ;;  %v879_v10 = vadd.f32 %v878_v8, %v2127_v40  ;;  %v687_v11 = vpop.f32.mrb[5].mxu0  ;;  %v880_v12 = vpop.f32.mrb[5].mxu1 }
 0x145   :  { %1541 = vst [vmem:[#allocation7 + $0x10] sm:$0xff] %v1783_v5  ;;  %1542 = vst [vmem:[#allocation7 + $0x18] sm:$0xff] %v1784_v6  ;;  %v688_v13 = vadd.f32 %v687_v11, %v2129_v41  ;;  %v881_v14 = vadd.f32 %v880_v12, %v2131_v42  ;;  %v689_v15 = vpop.f32.mrb[6].mxu0  ;;  %v882_v16 = vpop.f32.mrb[6].mxu1 }
 0x146   :  { %v1035_v17 = vmax.f32 %v686_v9, 0.0  ;;  %v1037_v18 = vmax.f32 %v879_v10, 0.0  ;;  %v690_v19 = vadd.f32 %v689_v15, %v2125_v39  ;;  %v883_v20 = vadd.f32 %v882_v16, %v2127_v40  ;;  %v691_v21 = vpop.f32.mrb[7].mxu0  ;;  %v884_v22 = vpop.f32.mrb[7].mxu1 }
 0x147   :  { %v1036_v23 = vmax.f32 %v688_v13, 0.0  ;;  %v1038_v24 = vmax.f32 %v881_v14, 0.0  ;;  %v692_v25 = vadd.f32 %v691_v21, %v2129_v41  ;;  %v885_v26 = vadd.f32 %v884_v22, %v2131_v42 }
 0x148   :  { %v1039_v27 = vmax.f32 %v690_v19, 0.0  ;;  %v1041_v28 = vmax.f32 %v883_v20, 0.0 }
 0x149   :  { %v1785_v29 = vpack.c.bf16 %v1036_v23, %v1035_v17  ;;  %v1786_v30 = vpack.c.bf16 %v1038_v24, %v1037_v18  ;;  %v1040_v31 = vmax.f32 %v692_v25, 0.0  ;;  %v1042_v32 = vmax.f32 %v885_v26, 0.0 }
 0x14b   :  { %1543 = vst [vmem:[#allocation7 + $0x20] sm:$0xff] %v1785_v29  ;;  %1544 = vst [vmem:[#allocation7 + $0x28] sm:$0xff] %v1786_v30  ;;  %v1787_v33 = vpack.c.bf16 %v1040_v31, %v1039_v27  ;;  %v1788_v34 = vpack.c.bf16 %v1042_v32, %v1041_v28  ;;  %v695_v35 = vpop.f32.mrb[8].mxu0  ;;  %v888_v36 = vpop.f32.mrb[8].mxu1 }
 0x14c   :  { %v696_v37 = vadd.f32 %v695_v35, %v2125_v39  ;;  %v889_v38 = vadd.f32 %v888_v36, %v2127_v40  ;;  %v697_v43 = vpop.f32.mrb[9].mxu0  ;;  %v890_v44 = vpop.f32.mrb[9].mxu1 }
 0x14d   :  { %1545 = vst [vmem:[#allocation7 + $0x30] sm:$0xff] %v1787_v33  ;;  %1546 = vst [vmem:[#allocation7 + $0x38] sm:$0xff] %v1788_v34  ;;  %v698_v45 = vadd.f32 %v697_v43, %v2129_v41  ;;  %v891_v46 = vadd.f32 %v890_v44, %v2131_v42  ;;  %v699_v47 = vpop.f32.mrb[10].mxu0  ;;  %v892_v48 = vpop.f32.mrb[10].mxu1 }
 0x14e   :  { %v1043_v49 = vmax.f32 %v696_v37, 0.0  ;;  %v1045_v50 = vmax.f32 %v889_v38, 0.0  ;;  %v700_v51 = vadd.f32 %v699_v47, %v2125_v39  ;;  %v893_v52 = vadd.f32 %v892_v48, %v2127_v40  ;;  %v701_v53 = vpop.f32.mrb[11].mxu0  ;;  %v894_v54 = vpop.f32.mrb[11].mxu1 }
 0x14f   :  { %v1044_v55 = vmax.f32 %v698_v45, 0.0  ;;  %v1046_v56 = vmax.f32 %v891_v46, 0.0  ;;  %v702_v57 = vadd.f32 %v701_v53, %v2129_v41  ;;  %v895_v58 = vadd.f32 %v894_v54, %v2131_v42 }
 0x150   :  { %v1047_v59 = vmax.f32 %v700_v51, 0.0  ;;  %v1049_v60 = vmax.f32 %v893_v52, 0.0 }
 0x151   :  { %v1789_v61 = vpack.c.bf16 %v1044_v55, %v1043_v49  ;;  %v1790_v62 = vpack.c.bf16 %v1046_v56, %v1045_v50  ;;  %v1048_v63 = vmax.f32 %v702_v57, 0.0  ;;  %v1050_v0 = vmax.f32 %v895_v58, 0.0 }
 0x153   :  { %1547 = vst [vmem:[#allocation7 + $0x40] sm:$0xff] %v1789_v61  ;;  %1548 = vst [vmem:[#allocation7 + $0x48] sm:$0xff] %v1790_v62  ;;  %v1791_v1 = vpack.c.bf16 %v1048_v63, %v1047_v59  ;;  %v1792_v2 = vpack.c.bf16 %v1050_v0, %v1049_v60  ;;  %v705_v3 = vpop.f32.mrb[12].mxu0  ;;  %v898_v4 = vpop.f32.mrb[12].mxu1 }
 0x154   :  { %v706_v5 = vadd.f32 %v705_v3, %v2125_v39  ;;  %v899_v6 = vadd.f32 %v898_v4, %v2127_v40  ;;  %v707_v7 = vpop.f32.mrb[13].mxu0  ;;  %v900_v8 = vpop.f32.mrb[13].mxu1 }
 0x155   :  { %1549 = vst [vmem:[#allocation7 + $0x50] sm:$0xff] %v1791_v1  ;;  %1550 = vst [vmem:[#allocation7 + $0x58] sm:$0xff] %v1792_v2  ;;  %v708_v9 = vadd.f32 %v707_v7, %v2129_v41  ;;  %v901_v10 = vadd.f32 %v900_v8, %v2131_v42  ;;  %v709_v11 = vpop.f32.mrb[14].mxu0  ;;  %v902_v12 = vpop.f32.mrb[14].mxu1 }
 0x156   :  { %v1051_v13 = vmax.f32 %v706_v5, 0.0  ;;  %v1053_v14 = vmax.f32 %v899_v6, 0.0  ;;  %v710_v15 = vadd.f32 %v709_v11, %v2125_v39  ;;  %v903_v16 = vadd.f32 %v902_v12, %v2127_v40  ;;  %v711_v17 = vpop.f32.mrb[15].mxu0  ;;  %v904_v18 = vpop.f32.mrb[15].mxu1 }
 0x157   :  { %v1052_v19 = vmax.f32 %v708_v9, 0.0  ;;  %v1054_v20 = vmax.f32 %v901_v10, 0.0  ;;  %v712_v21 = vadd.f32 %v711_v17, %v2129_v41  ;;  %v905_v22 = vadd.f32 %v904_v18, %v2131_v42 }
 0x158   :  { %v1055_v23 = vmax.f32 %v710_v15, 0.0  ;;  %v1057_v24 = vmax.f32 %v903_v16, 0.0 }
 0x159   :  { %v1793_v25 = vpack.c.bf16 %v1052_v19, %v1051_v13  ;;  %v1794_v26 = vpack.c.bf16 %v1054_v20, %v1053_v14  ;;  %v1056_v27 = vmax.f32 %v712_v21, 0.0  ;;  %v1058_v28 = vmax.f32 %v905_v22, 0.0 }
 0x15b   :  { %1551 = vst [vmem:[#allocation7 + $0x60] sm:$0xff] %v1793_v25  ;;  %1552 = vst [vmem:[#allocation7 + $0x68] sm:$0xff] %v1794_v26  ;;  %v1795_v29 = vpack.c.bf16 %v1056_v27, %v1055_v23  ;;  %v1796_v30 = vpack.c.bf16 %v1058_v28, %v1057_v24  ;;  %v715_v31 = vpop.f32.mrb[16].mxu0  ;;  %v908_v32 = vpop.f32.mrb[16].mxu1 }
 0x15c   :  { %v716_v33 = vadd.f32 %v715_v31, %v2125_v39  ;;  %v909_v34 = vadd.f32 %v908_v32, %v2127_v40  ;;  %v717_v35 = vpop.f32.mrb[17].mxu0  ;;  %v910_v36 = vpop.f32.mrb[17].mxu1 }
 0x15d   :  { %1553 = vst [vmem:[#allocation7 + $0x70] sm:$0xff] %v1795_v29  ;;  %1554 = vst [vmem:[#allocation7 + $0x78] sm:$0xff] %v1796_v30  ;;  %v718_v37 = vadd.f32 %v717_v35, %v2129_v41  ;;  %v911_v38 = vadd.f32 %v910_v36, %v2131_v42  ;;  %v719_v43 = vpop.f32.mrb[18].mxu0  ;;  %v912_v44 = vpop.f32.mrb[18].mxu1 }
 0x15e   :  { %v1059_v45 = vmax.f32 %v716_v33, 0.0  ;;  %v1061_v46 = vmax.f32 %v909_v34, 0.0  ;;  %v720_v47 = vadd.f32 %v719_v43, %v2125_v39  ;;  %v913_v48 = vadd.f32 %v912_v44, %v2127_v40  ;;  %v721_v49 = vpop.f32.mrb[19].mxu0  ;;  %v914_v50 = vpop.f32.mrb[19].mxu1 }
 0x15f   :  { %v1060_v51 = vmax.f32 %v718_v37, 0.0  ;;  %v1062_v52 = vmax.f32 %v911_v38, 0.0  ;;  %v722_v53 = vadd.f32 %v721_v49, %v2129_v41  ;;  %v915_v54 = vadd.f32 %v914_v50, %v2131_v42 }
 0x160   :  { %v1063_v55 = vmax.f32 %v720_v47, 0.0  ;;  %v1065_v56 = vmax.f32 %v913_v48, 0.0 }
 0x161   :  { %v1797_v57 = vpack.c.bf16 %v1060_v51, %v1059_v45  ;;  %v1798_v58 = vpack.c.bf16 %v1062_v52, %v1061_v46  ;;  %v1064_v59 = vmax.f32 %v722_v53, 0.0  ;;  %v1066_v60 = vmax.f32 %v915_v54, 0.0 }
 0x163   :  { %1555 = vst [vmem:[#allocation7 + $0x80] sm:$0xff] %v1797_v57  ;;  %1556 = vst [vmem:[#allocation7 + $0x88] sm:$0xff] %v1798_v58  ;;  %v1799_v61 = vpack.c.bf16 %v1064_v59, %v1063_v55  ;;  %v1800_v62 = vpack.c.bf16 %v1066_v60, %v1065_v56  ;;  %v725_v63 = vpop.f32.mrb[20].mxu0  ;;  %v918_v0 = vpop.f32.mrb[20].mxu1 }
 0x164   :  { %v726_v1 = vadd.f32 %v725_v63, %v2125_v39  ;;  %v919_v2 = vadd.f32 %v918_v0, %v2127_v40  ;;  %v727_v3 = vpop.f32.mrb[21].mxu0  ;;  %v920_v4 = vpop.f32.mrb[21].mxu1 }
 0x165   :  { %1557 = vst [vmem:[#allocation7 + $0x90] sm:$0xff] %v1799_v61  ;;  %1558 = vst [vmem:[#allocation7 + $0x98] sm:$0xff] %v1800_v62  ;;  %v728_v5 = vadd.f32 %v727_v3, %v2129_v41  ;;  %v921_v6 = vadd.f32 %v920_v4, %v2131_v42  ;;  %v729_v7 = vpop.f32.mrb[22].mxu0  ;;  %v922_v8 = vpop.f32.mrb[22].mxu1 }
 0x166   :  { %v1067_v9 = vmax.f32 %v726_v1, 0.0  ;;  %v1069_v10 = vmax.f32 %v919_v2, 0.0  ;;  %v730_v11 = vadd.f32 %v729_v7, %v2125_v39  ;;  %v923_v12 = vadd.f32 %v922_v8, %v2127_v40  ;;  %v731_v13 = vpop.f32.mrb[23].mxu0  ;;  %v924_v14 = vpop.f32.mrb[23].mxu1 }
 0x167   :  { %v1068_v15 = vmax.f32 %v728_v5, 0.0  ;;  %v1070_v16 = vmax.f32 %v921_v6, 0.0  ;;  %v732_v17 = vadd.f32 %v731_v13, %v2129_v41  ;;  %v925_v18 = vadd.f32 %v924_v14, %v2131_v42 }
 0x168   :  { %v1071_v19 = vmax.f32 %v730_v11, 0.0  ;;  %v1073_v20 = vmax.f32 %v923_v12, 0.0 }
 0x169   :  { %v1801_v21 = vpack.c.bf16 %v1068_v15, %v1067_v9  ;;  %v1802_v22 = vpack.c.bf16 %v1070_v16, %v1069_v10  ;;  %v1072_v23 = vmax.f32 %v732_v17, 0.0  ;;  %v1074_v24 = vmax.f32 %v925_v18, 0.0 }
 0x16b   :  { %1559 = vst [vmem:[#allocation7 + $0xa0] sm:$0xff] %v1801_v21  ;;  %1560 = vst [vmem:[#allocation7 + $0xa8] sm:$0xff] %v1802_v22  ;;  %v1803_v25 = vpack.c.bf16 %v1072_v23, %v1071_v19  ;;  %v1804_v26 = vpack.c.bf16 %v1074_v24, %v1073_v20  ;;  %v735_v27 = vpop.f32.mrb[24].mxu0  ;;  %v928_v28 = vpop.f32.mrb[24].mxu1 }
 0x16c   :  { %v736_v29 = vadd.f32 %v735_v27, %v2125_v39  ;;  %v929_v30 = vadd.f32 %v928_v28, %v2127_v40  ;;  %v737_v31 = vpop.f32.mrb[25].mxu0  ;;  %v930_v32 = vpop.f32.mrb[25].mxu1 }
 0x16d   :  { %1561 = vst [vmem:[#allocation7 + $0xb0] sm:$0xff] %v1803_v25  ;;  %1562 = vst [vmem:[#allocation7 + $0xb8] sm:$0xff] %v1804_v26  ;;  %v738_v33 = vadd.f32 %v737_v31, %v2129_v41  ;;  %v931_v34 = vadd.f32 %v930_v32, %v2131_v42  ;;  %v739_v35 = vpop.f32.mrb[26].mxu0  ;;  %v932_v36 = vpop.f32.mrb[26].mxu1 }
 0x16e   :  { %v1075_v37 = vmax.f32 %v736_v29, 0.0  ;;  %v1077_v38 = vmax.f32 %v929_v30, 0.0  ;;  %v740_v43 = vadd.f32 %v739_v35, %v2125_v39  ;;  %v933_v44 = vadd.f32 %v932_v36, %v2127_v40  ;;  %v741_v45 = vpop.f32.mrb[27].mxu0  ;;  %v934_v46 = vpop.f32.mrb[27].mxu1 }
 0x16f   :  { %v1076_v47 = vmax.f32 %v738_v33, 0.0  ;;  %v1078_v48 = vmax.f32 %v931_v34, 0.0  ;;  %v742_v49 = vadd.f32 %v741_v45, %v2129_v41  ;;  %v935_v50 = vadd.f32 %v934_v46, %v2131_v42 }
 0x170   :  { %v1079_v51 = vmax.f32 %v740_v43, 0.0  ;;  %v1081_v52 = vmax.f32 %v933_v44, 0.0 }
 0x171   :  { %v1805_v53 = vpack.c.bf16 %v1076_v47, %v1075_v37  ;;  %v1806_v54 = vpack.c.bf16 %v1078_v48, %v1077_v38  ;;  %v1080_v55 = vmax.f32 %v742_v49, 0.0  ;;  %v1082_v56 = vmax.f32 %v935_v50, 0.0 }
 0x173   :  { %1563 = vst [vmem:[#allocation7 + $0xc0] sm:$0xff] %v1805_v53  ;;  %1564 = vst [vmem:[#allocation7 + $0xc8] sm:$0xff] %v1806_v54  ;;  %v1807_v57 = vpack.c.bf16 %v1080_v55, %v1079_v51  ;;  %v1808_v58 = vpack.c.bf16 %v1082_v56, %v1081_v52  ;;  %v745_v59 = vpop.f32.mrb[28].mxu0  ;;  %v938_v60 = vpop.f32.mrb[28].mxu1 }
 0x174   :  { %v746_v61 = vadd.f32 %v745_v59, %v2125_v39  ;;  %v939_v62 = vadd.f32 %v938_v60, %v2127_v40  ;;  %v747_v63 = vpop.f32.mrb[29].mxu0  ;;  %v940_v0 = vpop.f32.mrb[29].mxu1 }
 0x175   :  { %1565 = vst [vmem:[#allocation7 + $0xd0] sm:$0xff] %v1807_v57  ;;  %1566 = vst [vmem:[#allocation7 + $0xd8] sm:$0xff] %v1808_v58  ;;  %v748_v1 = vadd.f32 %v747_v63, %v2129_v41  ;;  %v941_v2 = vadd.f32 %v940_v0, %v2131_v42  ;;  %v749_v3 = vpop.f32.mrb[30].mxu0  ;;  %v942_v4 = vpop.f32.mrb[30].mxu1 }
 0x176   :  { %v1083_v5 = vmax.f32 %v746_v61, 0.0  ;;  %v1085_v6 = vmax.f32 %v939_v62, 0.0  ;;  %v750_v7 = vadd.f32 %v749_v3, %v2125_v39  ;;  %v943_v8 = vadd.f32 %v942_v4, %v2127_v40  ;;  %v751_v9 = vpop.f32.mrb[31].mxu0  ;;  %v944_v10 = vpop.f32.mrb[31].mxu1 }
 0x177   :  { %v1084_v11 = vmax.f32 %v748_v1, 0.0  ;;  %v1086_v12 = vmax.f32 %v941_v2, 0.0  ;;  %v752_v13 = vadd.f32 %v751_v9, %v2129_v41  ;;  %v945_v14 = vadd.f32 %v944_v10, %v2131_v42 }
 0x178   :  { %v1087_v15 = vmax.f32 %v750_v7, 0.0  ;;  %v1089_v16 = vmax.f32 %v943_v8, 0.0 }
 0x179   :  { %v1809_v17 = vpack.c.bf16 %v1084_v11, %v1083_v5  ;;  %v1810_v18 = vpack.c.bf16 %v1086_v12, %v1085_v6  ;;  %v1088_v19 = vmax.f32 %v752_v13, 0.0  ;;  %v1090_v20 = vmax.f32 %v945_v14, 0.0 }
 0x17b   :  { %1567 = vst [vmem:[#allocation7 + $0xe0] sm:$0xff] %v1809_v17  ;;  %1568 = vst [vmem:[#allocation7 + $0xe8] sm:$0xff] %v1810_v18  ;;  %v1811_v21 = vpack.c.bf16 %v1088_v19, %v1087_v15  ;;  %v1812_v22 = vpack.c.bf16 %v1090_v20, %v1089_v16  ;;  %v755_v23 = vpop.f32.mrb[32].mxu0  ;;  %v948_v24 = vpop.f32.mrb[32].mxu1 }
 0x17c   :  { %v756_v25 = vadd.f32 %v755_v23, %v2125_v39  ;;  %v949_v26 = vadd.f32 %v948_v24, %v2127_v40  ;;  %v757_v27 = vpop.f32.mrb[33].mxu0  ;;  %v950_v28 = vpop.f32.mrb[33].mxu1 }
 0x17d   :  { %1569 = vst [vmem:[#allocation7 + $0xf0] sm:$0xff] %v1811_v21  ;;  %1570 = vst [vmem:[#allocation7 + $0xf8] sm:$0xff] %v1812_v22  ;;  %v758_v29 = vadd.f32 %v757_v27, %v2129_v41  ;;  %v951_v30 = vadd.f32 %v950_v28, %v2131_v42  ;;  %v759_v31 = vpop.f32.mrb[34].mxu0  ;;  %v952_v32 = vpop.f32.mrb[34].mxu1 }
 0x17e   :  { %v1091_v33 = vmax.f32 %v756_v25, 0.0  ;;  %v1093_v34 = vmax.f32 %v949_v26, 0.0  ;;  %v760_v35 = vadd.f32 %v759_v31, %v2125_v39  ;;  %v953_v36 = vadd.f32 %v952_v32, %v2127_v40  ;;  %v761_v37 = vpop.f32.mrb[35].mxu0  ;;  %v954_v38 = vpop.f32.mrb[35].mxu1 }
 0x17f   :  { %v1092_v43 = vmax.f32 %v758_v29, 0.0  ;;  %v1094_v44 = vmax.f32 %v951_v30, 0.0  ;;  %v762_v45 = vadd.f32 %v761_v37, %v2129_v41  ;;  %v955_v46 = vadd.f32 %v954_v38, %v2131_v42 }
 0x180   :  { %v1095_v47 = vmax.f32 %v760_v35, 0.0  ;;  %v1097_v48 = vmax.f32 %v953_v36, 0.0 }
 0x181   :  { %v1813_v49 = vpack.c.bf16 %v1092_v43, %v1091_v33  ;;  %v1814_v50 = vpack.c.bf16 %v1094_v44, %v1093_v34  ;;  %v1096_v51 = vmax.f32 %v762_v45, 0.0  ;;  %v1098_v52 = vmax.f32 %v955_v46, 0.0 }
 0x183   :  { %1571 = vst [vmem:[#allocation7 + $0x100] sm:$0xff] %v1813_v49  ;;  %1572 = vst [vmem:[#allocation7 + $0x108] sm:$0xff] %v1814_v50  ;;  %v1815_v53 = vpack.c.bf16 %v1096_v51, %v1095_v47  ;;  %v1816_v54 = vpack.c.bf16 %v1098_v52, %v1097_v48  ;;  %v765_v55 = vpop.f32.mrb[36].mxu0  ;;  %v958_v56 = vpop.f32.mrb[36].mxu1 }
 0x184   :  { %v766_v57 = vadd.f32 %v765_v55, %v2125_v39  ;;  %v959_v58 = vadd.f32 %v958_v56, %v2127_v40  ;;  %v767_v59 = vpop.f32.mrb[37].mxu0  ;;  %v960_v60 = vpop.f32.mrb[37].mxu1 }
 0x185   :  { %1573 = vst [vmem:[#allocation7 + $0x110] sm:$0xff] %v1815_v53  ;;  %1574 = vst [vmem:[#allocation7 + $0x118] sm:$0xff] %v1816_v54  ;;  %v768_v61 = vadd.f32 %v767_v59, %v2129_v41  ;;  %v961_v62 = vadd.f32 %v960_v60, %v2131_v42  ;;  %v769_v63 = vpop.f32.mrb[38].mxu0  ;;  %v962_v0 = vpop.f32.mrb[38].mxu1 }
 0x186   :  { %v1099_v1 = vmax.f32 %v766_v57, 0.0  ;;  %v1101_v2 = vmax.f32 %v959_v58, 0.0  ;;  %v770_v3 = vadd.f32 %v769_v63, %v2125_v39  ;;  %v963_v4 = vadd.f32 %v962_v0, %v2127_v40  ;;  %v771_v5 = vpop.f32.mrb[39].mxu0  ;;  %v964_v6 = vpop.f32.mrb[39].mxu1 }
 0x187   :  { %v1100_v7 = vmax.f32 %v768_v61, 0.0  ;;  %v1102_v8 = vmax.f32 %v961_v62, 0.0  ;;  %v772_v9 = vadd.f32 %v771_v5, %v2129_v41  ;;  %v965_v10 = vadd.f32 %v964_v6, %v2131_v42 }
 0x188   :  { %v1103_v11 = vmax.f32 %v770_v3, 0.0  ;;  %v1105_v12 = vmax.f32 %v963_v4, 0.0 }
 0x189   :  { %v1817_v13 = vpack.c.bf16 %v1100_v7, %v1099_v1  ;;  %v1818_v14 = vpack.c.bf16 %v1102_v8, %v1101_v2  ;;  %v1104_v15 = vmax.f32 %v772_v9, 0.0  ;;  %v1106_v16 = vmax.f32 %v965_v10, 0.0 }
 0x18b   :  { %1575 = vst [vmem:[#allocation7 + $0x120] sm:$0xff] %v1817_v13  ;;  %1576 = vst [vmem:[#allocation7 + $0x128] sm:$0xff] %v1818_v14  ;;  %v1819_v17 = vpack.c.bf16 %v1104_v15, %v1103_v11  ;;  %v1820_v18 = vpack.c.bf16 %v1106_v16, %v1105_v12  ;;  %v775_v19 = vpop.f32.mrb[40].mxu0  ;;  %v968_v20 = vpop.f32.mrb[40].mxu1 }
 0x18c   :  { %v776_v21 = vadd.f32 %v775_v19, %v2125_v39  ;;  %v969_v22 = vadd.f32 %v968_v20, %v2127_v40  ;;  %v777_v23 = vpop.f32.mrb[41].mxu0  ;;  %v970_v24 = vpop.f32.mrb[41].mxu1 }
 0x18d   :  { %1577 = vst [vmem:[#allocation7 + $0x130] sm:$0xff] %v1819_v17  ;;  %1578 = vst [vmem:[#allocation7 + $0x138] sm:$0xff] %v1820_v18  ;;  %v778_v25 = vadd.f32 %v777_v23, %v2129_v41  ;;  %v971_v26 = vadd.f32 %v970_v24, %v2131_v42  ;;  %v779_v27 = vpop.f32.mrb[42].mxu0  ;;  %v972_v28 = vpop.f32.mrb[42].mxu1 }
 0x18e   :  { %v1107_v29 = vmax.f32 %v776_v21, 0.0  ;;  %v1109_v30 = vmax.f32 %v969_v22, 0.0  ;;  %v780_v31 = vadd.f32 %v779_v27, %v2125_v39  ;;  %v973_v32 = vadd.f32 %v972_v28, %v2127_v40  ;;  %v781_v33 = vpop.f32.mrb[43].mxu0  ;;  %v974_v34 = vpop.f32.mrb[43].mxu1 }
 0x18f   :  { %v1108_v35 = vmax.f32 %v778_v25, 0.0  ;;  %v1110_v36 = vmax.f32 %v971_v26, 0.0  ;;  %v782_v37 = vadd.f32 %v781_v33, %v2129_v41  ;;  %v975_v38 = vadd.f32 %v974_v34, %v2131_v42 }
 0x190   :  { %v1111_v43 = vmax.f32 %v780_v31, 0.0  ;;  %v1113_v44 = vmax.f32 %v973_v32, 0.0 }
 0x191   :  { %v1821_v45 = vpack.c.bf16 %v1108_v35, %v1107_v29  ;;  %v1822_v46 = vpack.c.bf16 %v1110_v36, %v1109_v30  ;;  %v1112_v47 = vmax.f32 %v782_v37, 0.0  ;;  %v1114_v48 = vmax.f32 %v975_v38, 0.0 }
 0x193   :  { %1579 = vst [vmem:[#allocation7 + $0x140] sm:$0xff] %v1821_v45  ;;  %1580 = vst [vmem:[#allocation7 + $0x148] sm:$0xff] %v1822_v46  ;;  %v1823_v49 = vpack.c.bf16 %v1112_v47, %v1111_v43  ;;  %v1824_v50 = vpack.c.bf16 %v1114_v48, %v1113_v44  ;;  %v785_v51 = vpop.f32.mrb[44].mxu0  ;;  %v978_v52 = vpop.f32.mrb[44].mxu1 }
 0x194   :  { %v786_v53 = vadd.f32 %v785_v51, %v2125_v39  ;;  %v979_v54 = vadd.f32 %v978_v52, %v2127_v40  ;;  %v787_v55 = vpop.f32.mrb[45].mxu0  ;;  %v980_v56 = vpop.f32.mrb[45].mxu1 }
 0x195   :  { %1581 = vst [vmem:[#allocation7 + $0x150] sm:$0xff] %v1823_v49  ;;  %1582 = vst [vmem:[#allocation7 + $0x158] sm:$0xff] %v1824_v50  ;;  %v788_v57 = vadd.f32 %v787_v55, %v2129_v41  ;;  %v981_v58 = vadd.f32 %v980_v56, %v2131_v42  ;;  %v789_v59 = vpop.f32.mrb[46].mxu0  ;;  %v982_v60 = vpop.f32.mrb[46].mxu1 }
 0x196   :  { %v1115_v61 = vmax.f32 %v786_v53, 0.0  ;;  %v1117_v62 = vmax.f32 %v979_v54, 0.0  ;;  %v790_v63 = vadd.f32 %v789_v59, %v2125_v39  ;;  %v983_v0 = vadd.f32 %v982_v60, %v2127_v40  ;;  %v791_v1 = vpop.f32.mrb[47].mxu0  ;;  %v984_v2 = vpop.f32.mrb[47].mxu1 }
 0x197   :  { %v1116_v3 = vmax.f32 %v788_v57, 0.0  ;;  %v1118_v4 = vmax.f32 %v981_v58, 0.0  ;;  %v792_v5 = vadd.f32 %v791_v1, %v2129_v41  ;;  %v985_v6 = vadd.f32 %v984_v2, %v2131_v42 }
 0x198   :  { %v1119_v7 = vmax.f32 %v790_v63, 0.0  ;;  %v1121_v8 = vmax.f32 %v983_v0, 0.0 }
 0x199   :  { %v1825_v9 = vpack.c.bf16 %v1116_v3, %v1115_v61  ;;  %v1826_v10 = vpack.c.bf16 %v1118_v4, %v1117_v62  ;;  %v1120_v11 = vmax.f32 %v792_v5, 0.0  ;;  %v1122_v12 = vmax.f32 %v985_v6, 0.0 }
 0x19b   :  { %1583 = vst [vmem:[#allocation7 + $0x160] sm:$0xff] %v1825_v9  ;;  %1584 = vst [vmem:[#allocation7 + $0x168] sm:$0xff] %v1826_v10  ;;  %v1827_v13 = vpack.c.bf16 %v1120_v11, %v1119_v7  ;;  %v1828_v14 = vpack.c.bf16 %v1122_v12, %v1121_v8  ;;  %v795_v15 = vpop.f32.mrb[48].mxu0  ;;  %v988_v16 = vpop.f32.mrb[48].mxu1 }
 0x19c   :  { %v796_v17 = vadd.f32 %v795_v15, %v2125_v39  ;;  %v989_v18 = vadd.f32 %v988_v16, %v2127_v40  ;;  %v797_v19 = vpop.f32.mrb[49].mxu0  ;;  %v990_v20 = vpop.f32.mrb[49].mxu1 }
 0x19d   :  { %1585 = vst [vmem:[#allocation7 + $0x170] sm:$0xff] %v1827_v13  ;;  %1586 = vst [vmem:[#allocation7 + $0x178] sm:$0xff] %v1828_v14  ;;  %v798_v21 = vadd.f32 %v797_v19, %v2129_v41  ;;  %v991_v22 = vadd.f32 %v990_v20, %v2131_v42  ;;  %v799_v23 = vpop.f32.mrb[50].mxu0  ;;  %v992_v24 = vpop.f32.mrb[50].mxu1 }
 0x19e   :  { %v1123_v25 = vmax.f32 %v796_v17, 0.0  ;;  %v1125_v26 = vmax.f32 %v989_v18, 0.0  ;;  %v800_v27 = vadd.f32 %v799_v23, %v2125_v39  ;;  %v993_v28 = vadd.f32 %v992_v24, %v2127_v40  ;;  %v801_v29 = vpop.f32.mrb[51].mxu0  ;;  %v994_v30 = vpop.f32.mrb[51].mxu1 }
 0x19f   :  { %v1124_v31 = vmax.f32 %v798_v21, 0.0  ;;  %v1126_v32 = vmax.f32 %v991_v22, 0.0  ;;  %v802_v33 = vadd.f32 %v801_v29, %v2129_v41  ;;  %v995_v34 = vadd.f32 %v994_v30, %v2131_v42 }
 0x1a0   :  { %v1127_v35 = vmax.f32 %v800_v27, 0.0  ;;  %v1129_v36 = vmax.f32 %v993_v28, 0.0 }
 0x1a1   :  { %v1829_v37 = vpack.c.bf16 %v1124_v31, %v1123_v25  ;;  %v1830_v38 = vpack.c.bf16 %v1126_v32, %v1125_v26  ;;  %v1128_v43 = vmax.f32 %v802_v33, 0.0  ;;  %v1130_v44 = vmax.f32 %v995_v34, 0.0 }
 0x1a3   :  { %1587 = vst [vmem:[#allocation7 + $0x180] sm:$0xff] %v1829_v37  ;;  %1588 = vst [vmem:[#allocation7 + $0x188] sm:$0xff] %v1830_v38  ;;  %v1831_v45 = vpack.c.bf16 %v1128_v43, %v1127_v35  ;;  %v1832_v46 = vpack.c.bf16 %v1130_v44, %v1129_v36  ;;  %v805_v47 = vpop.f32.mrb[52].mxu0  ;;  %v998_v48 = vpop.f32.mrb[52].mxu1 }
 0x1a4   :  { %v806_v49 = vadd.f32 %v805_v47, %v2125_v39  ;;  %v999_v50 = vadd.f32 %v998_v48, %v2127_v40  ;;  %v807_v51 = vpop.f32.mrb[53].mxu0  ;;  %v1000_v52 = vpop.f32.mrb[53].mxu1 }
 0x1a5   :  { %1589 = vst [vmem:[#allocation7 + $0x190] sm:$0xff] %v1831_v45  ;;  %1590 = vst [vmem:[#allocation7 + $0x198] sm:$0xff] %v1832_v46  ;;  %v808_v53 = vadd.f32 %v807_v51, %v2129_v41  ;;  %v1001_v54 = vadd.f32 %v1000_v52, %v2131_v42  ;;  %v809_v55 = vpop.f32.mrb[54].mxu0  ;;  %v1002_v56 = vpop.f32.mrb[54].mxu1 }
 0x1a6   :  { %v1131_v57 = vmax.f32 %v806_v49, 0.0  ;;  %v1133_v58 = vmax.f32 %v999_v50, 0.0  ;;  %v810_v59 = vadd.f32 %v809_v55, %v2125_v39  ;;  %v1003_v60 = vadd.f32 %v1002_v56, %v2127_v40  ;;  %v811_v61 = vpop.f32.mrb[55].mxu0  ;;  %v1004_v62 = vpop.f32.mrb[55].mxu1 }
 0x1a7   :  { %v1132_v63 = vmax.f32 %v808_v53, 0.0  ;;  %v1134_v0 = vmax.f32 %v1001_v54, 0.0  ;;  %v812_v1 = vadd.f32 %v811_v61, %v2129_v41  ;;  %v1005_v2 = vadd.f32 %v1004_v62, %v2131_v42 }
 0x1a8   :  { %v1135_v3 = vmax.f32 %v810_v59, 0.0  ;;  %v1137_v4 = vmax.f32 %v1003_v60, 0.0 }
 0x1a9   :  { %v1833_v5 = vpack.c.bf16 %v1132_v63, %v1131_v57  ;;  %v1834_v6 = vpack.c.bf16 %v1134_v0, %v1133_v58  ;;  %v1136_v7 = vmax.f32 %v812_v1, 0.0  ;;  %v1138_v8 = vmax.f32 %v1005_v2, 0.0 }
 0x1ab   :  { %1591 = vst [vmem:[#allocation7 + $0x1a0] sm:$0xff] %v1833_v5  ;;  %1592 = vst [vmem:[#allocation7 + $0x1a8] sm:$0xff] %v1834_v6  ;;  %v1835_v9 = vpack.c.bf16 %v1136_v7, %v1135_v3  ;;  %v1836_v10 = vpack.c.bf16 %v1138_v8, %v1137_v4  ;;  %v815_v11 = vpop.f32.mrb[56].mxu0  ;;  %v1008_v12 = vpop.f32.mrb[56].mxu1 }
 0x1ac   :  { %v816_v13 = vadd.f32 %v815_v11, %v2125_v39  ;;  %v1009_v14 = vadd.f32 %v1008_v12, %v2127_v40  ;;  %v817_v15 = vpop.f32.mrb[57].mxu0  ;;  %v1010_v16 = vpop.f32.mrb[57].mxu1 }
 0x1ad   :  { %1593 = vst [vmem:[#allocation7 + $0x1b0] sm:$0xff] %v1835_v9  ;;  %1594 = vst [vmem:[#allocation7 + $0x1b8] sm:$0xff] %v1836_v10  ;;  %v818_v17 = vadd.f32 %v817_v15, %v2129_v41  ;;  %v1011_v18 = vadd.f32 %v1010_v16, %v2131_v42  ;;  %v819_v19 = vpop.f32.mrb[58].mxu0  ;;  %v1012_v20 = vpop.f32.mrb[58].mxu1 }
 0x1ae   :  { %v1139_v21 = vmax.f32 %v816_v13, 0.0  ;;  %v1141_v22 = vmax.f32 %v1009_v14, 0.0  ;;  %v820_v23 = vadd.f32 %v819_v19, %v2125_v39  ;;  %v1013_v24 = vadd.f32 %v1012_v20, %v2127_v40  ;;  %v821_v25 = vpop.f32.mrb[59].mxu0  ;;  %v1014_v26 = vpop.f32.mrb[59].mxu1 }
 0x1af   :  { %v1140_v27 = vmax.f32 %v818_v17, 0.0  ;;  %v1142_v28 = vmax.f32 %v1011_v18, 0.0  ;;  %v822_v29 = vadd.f32 %v821_v25, %v2129_v41  ;;  %v1015_v30 = vadd.f32 %v1014_v26, %v2131_v42 }
 0x1b0   :  { %v1143_v31 = vmax.f32 %v820_v23, 0.0  ;;  %v1145_v32 = vmax.f32 %v1013_v24, 0.0 }
 0x1b1   :  { %v1837_v33 = vpack.c.bf16 %v1140_v27, %v1139_v21  ;;  %v1838_v34 = vpack.c.bf16 %v1142_v28, %v1141_v22  ;;  %v1144_v35 = vmax.f32 %v822_v29, 0.0  ;;  %v1146_v36 = vmax.f32 %v1015_v30, 0.0 }
 0x1b3   :  { %1595 = vst [vmem:[#allocation7 + $0x1c0] sm:$0xff] %v1837_v33  ;;  %1596 = vst [vmem:[#allocation7 + $0x1c8] sm:$0xff] %v1838_v34  ;;  %v1839_v37 = vpack.c.bf16 %v1144_v35, %v1143_v31  ;;  %v1840_v38 = vpack.c.bf16 %v1146_v36, %v1145_v32  ;;  %v825_v43 = vpop.f32.mrb[60].mxu0  ;;  %v1018_v44 = vpop.f32.mrb[60].mxu1 }
 0x1b4   :  { %v826_v45 = vadd.f32 %v825_v43, %v2125_v39  ;;  %v1019_v46 = vadd.f32 %v1018_v44, %v2127_v40  ;;  %v827_v47 = vpop.f32.mrb[61].mxu0  ;;  %v1020_v48 = vpop.f32.mrb[61].mxu1 }
 0x1b5   :  { %1597 = vst [vmem:[#allocation7 + $0x1d0] sm:$0xff] %v1839_v37  ;;  %1598 = vst [vmem:[#allocation7 + $0x1d8] sm:$0xff] %v1840_v38  ;;  %v828_v49 = vadd.f32 %v827_v47, %v2129_v41  ;;  %v1021_v50 = vadd.f32 %v1020_v48, %v2131_v42  ;;  %v829_v51 = vpop.f32.mrb[62].mxu0  ;;  %v1022_v52 = vpop.f32.mrb[62].mxu1 }
 0x1b6   :  { %v1147_v53 = vmax.f32 %v826_v45, 0.0  ;;  %v1149_v54 = vmax.f32 %v1019_v46, 0.0  ;;  %v830_v55 = vadd.f32 %v829_v51, %v2125_v39  ;;  %v1023_v56 = vadd.f32 %v1022_v52, %v2127_v40  ;;  %v831_v57 = vpop.f32.mrb[63].mxu0  ;;  %v1024_v58 = vpop.f32.mrb[63].mxu1 }
 0x1b7   :  { %v1148_v59 = vmax.f32 %v828_v49, 0.0  ;;  %v1150_v60 = vmax.f32 %v1021_v50, 0.0  ;;  %v832_v61 = vadd.f32 %v831_v57, %v2129_v41  ;;  %v1025_v62 = vadd.f32 %v1024_v58, %v2131_v42 }
 0x1b8   :  { %v1151_v63 = vmax.f32 %v830_v55, 0.0  ;;  %v1153_v0 = vmax.f32 %v1023_v56, 0.0 }
 0x1b9   :  { %v1841_v1 = vpack.c.bf16 %v1148_v59, %v1147_v53  ;;  %v1842_v2 = vpack.c.bf16 %v1150_v60, %v1149_v54  ;;  %v1152_v3 = vmax.f32 %v832_v61, 0.0  ;;  %v1154_v4 = vmax.f32 %v1025_v62, 0.0 }
 0x1bb   :  { %1599 = vst [vmem:[#allocation7 + $0x1e0] sm:$0xff] %v1841_v1  ;;  %1600 = vst [vmem:[#allocation7 + $0x1e8] sm:$0xff] %v1842_v2  ;;  %v1843_v39 = vpack.c.bf16 %v1152_v3, %v1151_v63  ;;  %v1844_v40 = vpack.c.bf16 %v1154_v4, %v1153_v0 }
 0x1bd   :  { %1601 = vst [vmem:[#allocation7 + $0x1f0] sm:$0xff] %v1843_v39  ;;  %1602 = vst [vmem:[#allocation7 + $0x1f8] sm:$0xff] %v1844_v40 }
 0x1be   :  { %2051 = shalt.err (!%p2048_p6)
}
 0x1bf   :  { %s2052_s17 = scalar_lea.hbm %s2279_s3, 8192 }
 0x1c0   :  { %p2053_p7 = scmp.ne.s32.totalorder %s2279_s3, %s2052_s17  ;;  %p2056_p8 = scmp.lt.u32.totalorder %s2052_s17, %s2279_s3 }
 0x1c2   :  { %p2058_p9 = pnand %p2056_p8, %p2053_p7 }
 0x1c4   :  { %2061 = shalt.err (!%p2058_p9)
}
 0x1c5   :  { %1614 = dma.vmem_to_hbm [thread:$0]  %s1609_s13, 8192, %s2279_s3, [#allocation4], %s2072_s0, %s2072_s0, %s2073_s9  }
 0x1c6   :  { %2066 = dma.done.wait [#allocation4], 8192  }
 0x1c7   :  { %2067 = vsyncadd [#allocation4], 4294959104 }
 0x1c8   :  { %1618 = vsyncpa [#allocation3], 1 }
 0x1c9   :  { %1619 = vsyncpa [#allocation6], 1 }
 0x1ca   :  { %1620 = vsyncpa [#allocation4], 1 }

</bundles_post_ra>
